<compile_context>
chip_gen: v6e
topology: v6e:2x2x1
jax: 0.10.0
libtpu: 0.0.40
codegen_flags: <defaults>
</compile_context>

<pallas_src>
import functools
import math

import jax
import jax.numpy as jnp
from jax.experimental import pallas as pl
from jax.experimental.pallas import tpu as pltpu

_BN_EPS = 1e-5
_HALO = 8  # sublane-aligned halo block; supports kernel_size // 2 <= 8 (k <= 17)


def _round_up(a, b):
    return (a + b - 1) // b * b


def _vmem_limit_bytes():
    # Adaptive scoped-VMEM limit (~3/4 of physical, capped at 100 MiB) so larger,
    # roofline-friendly tiles fit on v5e/v6e while staying inside v7x's 64 MiB.
    try:
        cap = pltpu.get_tpu_info().vmem_capacity_bytes
        return min(int(cap * 3 // 4), 100 * 1024 * 1024)
    except Exception:
        return None


def _compiler_params(dimension_semantics):
    kw = dict(dimension_semantics=dimension_semantics)
    vl = _vmem_limit_bytes()
    if vl is not None:
        kw["vmem_limit_bytes"] = vl
    return pltpu.CompilerParams(**kw)


def _erf(x):
    # Abramowitz & Stegun 7.1.26 rational approximation (|err| < 1.5e-7).
    # Uses only exp/abs/where, which are guaranteed to lower in Mosaic.
    a1, a2, a3, a4, a5 = (0.254829592, -0.284496736, 1.421413741,
                          -1.453152027, 1.061405429)
    p = 0.3275911
    sgn = jnp.where(x >= 0.0, 1.0, -1.0)
    ax = jnp.abs(x)
    t = 1.0 / (1.0 + p * ax)
    poly = t * (a1 + t * (a2 + t * (a3 + t * (a4 + t * a5))))
    return sgn * (1.0 - poly * jnp.exp(-ax * ax))


def _gelu_exact(x):
    return 0.5 * x * (1.0 + _erf(x * (1.0 / math.sqrt(2.0))))


def _bn_stats_kernel(x_ref, o_ref):
    # Accumulate per-channel [sum; sum of squares] over row tiles (output resident).
    i = pl.program_id(0)

    @pl.when(i == 0)
    def _():
        o_ref[...] = jnp.zeros_like(o_ref)

    x = x_ref[...].astype(jnp.float32)
    s = jnp.sum(x, axis=0, keepdims=True)
    ss = jnp.sum(x * x, axis=0, keepdims=True)
    o_ref[...] += jnp.concatenate([s, ss], axis=0)


def _convblock_kernel(prev_ref, x_ref, next_ref, scale_ref, shift_ref, w_ref,
                      b_ref, o_ref, *, seq_len, tm, ksize, mm_dtype):
    # prev/next: (8, C_in) halo blocks; x_ref: (TM, C_in) row tile;
    # scale/shift: (1, C_in) folded BN; w_ref: (k, C_in, TN); b_ref: (1, TN);
    # o_ref: (TM, TN).  BN/GELU math in f32, matmul operands cast to mm_dtype.
    pad = ksize // 2
    scale = scale_ref[...]
    shift = shift_ref[...]

    if pad == 0:
        h = _gelu_exact(x_ref[...].astype(jnp.float32) * scale + shift)
        acc = jnp.dot(h.astype(mm_dtype), w_ref[0],
                      preferred_element_type=jnp.float32)
    else:
        i = pl.program_id(1)  # row-tile index
        x_ext = jnp.concatenate(
            [prev_ref[...], x_ref[...], next_ref[...]], axis=0).astype(jnp.float32)
        h_ext = _gelu_exact(x_ext * scale + shift).astype(mm_dtype)  # (TM+16, C_in)

        # Global l-position of each output row in this tile (rows are flattened N*L).
        r = jax.lax.broadcasted_iota(jnp.int32, (tm, 1), 0)
        l_idx = (i * tm + r) % seq_len

        acc = jnp.zeros((tm, o_ref.shape[-1]), jnp.float32)
        for t in range(ksize):
            off = t - pad
            tap = h_ext[_HALO + off:_HALO + off + tm, :]
            src = l_idx + off
            # Zero contributions from outside [0, L): reproduces PyTorch zero
            # padding and prevents leakage across sample boundaries.
            valid = jnp.logical_and(src >= 0, src < seq_len)
            tap = jnp.where(valid, tap, jnp.zeros_like(tap))
            acc = acc + jnp.dot(tap, w_ref[t], preferred_element_type=jnp.float32)

    o_ref[...] = (acc + b_ref[...]).astype(o_ref.dtype)


def conv_block(x, gamma, beta, w, b, *, kernel_size=1,
               block_rows=512, matmul_dtype=jnp.bfloat16):
    """Pallas ConvBlock.  x: (N, C_in, L); w: (C_out, C_in, k); returns (N, C_out, L)."""
    assert kernel_size % 2 == 1, "even kernel_size changes PyTorch output length (unsupported)"
    assert kernel_size // 2 <= _HALO, "kernel_size > 17 not supported by the 8-row halo"

    n, c_in, l = x.shape
    c_out = w.shape[0]
    r_rows = n * l

    c_in_p = _round_up(c_in, 128)
    c_out_p = _round_up(c_out, 128)
    tn = 256 if c_out_p % 256 == 0 else 128          # lane-dense C_out tile
    tm = max(8, min(_round_up(block_rows, 8), _round_up(r_rows, 8)))
    rp = _round_up(r_rows, tm)
    n_row = rp // tm
    n_cout = c_out_p // tn
    hb = tm // _HALO

    # NCL -> channels-last flattened rows; pad rows with `tm` zeros at the head (so the
    # i-th row tile is block i+1 and its 8-row halos are always in-bounds) and with
    # (rp - r_rows + tm) zeros at the tail; pad channels to a multiple of 128.
    x2 = jnp.transpose(x, (0, 2, 1)).reshape(r_rows, c_in)
    x_ext = jnp.pad(x2, ((tm, rp - r_rows + tm), (0, c_in_p - c_in)))

    # ---- pass 1: global BN statistics (single pass: sum and sum of squares) ----
    stats = pl.pallas_call(
        _bn_stats_kernel,
        out_shape=jax.ShapeDtypeStruct((2, c_in_p), jnp.float32),
        grid=(x_ext.shape[0] // tm,),
        in_specs=[pl.BlockSpec((tm, c_in_p), lambda i: (i, 0))],
        out_specs=pl.BlockSpec((2, c_in_p), lambda i: (0, 0)),
        compiler_params=_compiler_params(("arbitrary",)),
    )(x_ext)

    cnt = float(r_rows)
    gamma_p = jnp.pad(gamma.astype(jnp.float32), (0, c_in_p - c_in)).reshape(1, c_in_p)
    beta_p = jnp.pad(beta.astype(jnp.float32), (0, c_in_p - c_in)).reshape(1, c_in_p)
    mean = stats[0:1] / cnt
    var = jnp.maximum(stats[1:2] / cnt - mean * mean, 0.0)   # biased (training-mode) variance
    scale = gamma_p * jax.lax.rsqrt(var + _BN_EPS)            # (1, C_in)
    shift = beta_p - mean * scale                             # (1, C_in)

    # Conv weights: (C_out, C_in, k) -> (k, C_in_p, C_out_p), cast for the MXU.
    wk = jnp.pad(jnp.transpose(w, (2, 1, 0)),
                 ((0, 0), (0, c_in_p - c_in), (0, c_out_p - c_out))).astype(matmul_dtype)
    b_p = jnp.pad(b.astype(jnp.float32), (0, c_out_p - c_out)).reshape(1, c_out_p)

    # ---- pass 2: fused BN-scale + GELU + Conv1d over (C_out tiles, row tiles) ----
    out_p = pl.pallas_call(
        functools.partial(_convblock_kernel, seq_len=l, tm=tm,
                          ksize=kernel_size, mm_dtype=matmul_dtype),
        out_shape=jax.ShapeDtypeStruct((rp, c_out_p), x.dtype),
        grid=(n_cout, n_row),
        in_specs=[
            pl.BlockSpec((_HALO, c_in_p), lambda j, i: ((i + 1) * hb - 1, 0)),  # prev halo
            pl.BlockSpec((tm, c_in_p), lambda j, i: (i + 1, 0)),                # row tile
            pl.BlockSpec((_HALO, c_in_p), lambda j, i: ((i + 2) * hb, 0)),      # next halo
            pl.BlockSpec((1, c_in_p), lambda j, i: (0, 0)),                     # scale
            pl.BlockSpec((1, c_in_p), lambda j, i: (0, 0)),                     # shift
            pl.BlockSpec((kernel_size, c_in_p, tn), lambda j, i: (0, 0, j)),    # weights
            pl.BlockSpec((1, tn), lambda j, i: (0, j)),                         # bias
        ],
        out_specs=pl.BlockSpec((tm, tn), lambda j, i: (i, j)),
        compiler_params=_compiler_params(("parallel", "parallel")),
    )(x_ext, x_ext, x_ext, scale, shift, wk, b_p)

    out = out_p[:r_rows, :c_out].reshape(n, l, c_out)
    return jnp.transpose(out, (0, 2, 1))


def conv_block_ref(x, gamma, beta, w, b, *, kernel_size=1):
    """Pure-JAX reference mirroring the PyTorch module (training-mode BN)."""
    mean = jnp.mean(x, axis=(0, 2), keepdims=True)
    var = jnp.mean((x - mean) ** 2, axis=(0, 2), keepdims=True)
    y = ((x - mean) * jax.lax.rsqrt(var + _BN_EPS)
         * gamma.reshape(1, -1, 1) + beta.reshape(1, -1, 1))
    h = jax.nn.gelu(y, approximate=False)
    pad = kernel_size // 2
    out = jax.lax.conv_general_dilated(
        h, w, window_strides=(1,), padding=[(pad, pad)],
        dimension_numbers=("NCH", "OIH", "NCH"))
    return out + b.reshape(1, -1, 1)


if __name__ == "__main__":
    # Small shapes consistent with the Enformer ConvBlock usage:
    # ConvLayer uses kernel_size=5, Stem / conv_block2 use kernel_size=1.
    N, C_IN, C_OUT, L = 2, 4, 8, 16

    key = jax.random.PRNGKey(0)
    kx, kg, kb0, kw5, kb5, kw1, kb1 = jax.random.split(key, 7)
    x = jax.random.normal(kx, (N, C_IN, L), dtype=jnp.float32)
    gamma = 1.0 + 0.1 * jax.random.normal(kg, (C_IN,), jnp.float32)
    beta = 0.1 * jax.random.normal(kb0, (C_IN,), jnp.float32)

    for ksize, kw, kb in ((5, kw5, kb5), (1, kw1, kb1)):
        bound = 1.0 / math.sqrt(C_IN * ksize)
        w = jax.random.uniform(kw, (C_OUT, C_IN, ksize), jnp.float32, -bound, bound)
        b = jax.random.uniform(kb, (C_OUT,), jnp.float32, -bound, bound)

        ref = conv_block_ref(x, gamma, beta, w, b, kernel_size=ksize)

        # f32-matmul path with small row tiles (exercises multi-tile halo + masks).
        out_f32 = jax.block_until_ready(conv_block(
            x, gamma, beta, w, b, kernel_size=ksize,
            matmul_dtype=jnp.float32, block_rows=8))
        assert out_f32.shape == (N, C_OUT, L), out_f32.shape
        assert jnp.allclose(out_f32, ref, atol=1e-4, rtol=1e-4), (
            ksize, float(jnp.max(jnp.abs(out_f32 - ref))))

        # Default (bf16 MXU operands, f32 accumulation) with small row tiles.
        out_bf16 = jax.block_until_ready(conv_block(
            x, gamma, beta, w, b, kernel_size=ksize, block_rows=8))
        assert jnp.allclose(out_bf16, ref, atol=5e-2, rtol=5e-2), (
            ksize, float(jnp.max(jnp.abs(out_bf16 - ref))))

        # Default tile sizes (single row tile at these tiny shapes) also run clean.
        out_def = jax.block_until_ready(conv_block(
            x, gamma, beta, w, b, kernel_size=ksize))
        assert jnp.allclose(out_def, ref, atol=5e-2, rtol=5e-2), (
            ksize, float(jnp.max(jnp.abs(out_def - ref))))

    print("KERNEL_OK")
</pallas_src>

<mosaic_0001>
module attributes {stable_mosaic.version = 11 : i64} {
  func.func @_bn_stats_kernel(%arg0: i32, %arg1: memref<8x128xf32, #tpu.memory_space<vmem>>, %arg2: memref<2x128xf32, #tpu.memory_space<vmem>>) attributes {dimension_semantics = [#tpu.dimension_semantics<arbitrary>], iteration_bounds = array<i64: 6>, scalar_prefetch = 0 : i64, scratch_operands = 0 : i64, tpu.core_type = #tpu.core_type<tc>, window_params = [{transform_indices = @transform_0, window_bounds = array<i64: 8, 128>}, {pipeline_mode = #tpu.pipeline_mode<synchronous>, transform_indices = @transform_1, window_bounds = array<i64: 2, 128>}]} {
    %c0_i32 = arith.constant 0 : i32
    %0 = arith.cmpi eq, %arg0, %c0_i32 : i32
    %1 = arith.extui %0 : i1 to i32
    %c0_i32_0 = arith.constant 0 : i32
    %2 = arith.cmpi ne, %1, %c0_i32_0 : i32
    scf.if %2 {
      %cst_7 = arith.constant 0.000000e+00 : f32
      %13 = vector.broadcast %cst_7 : f32 to vector<2x128xf32>
      %c0_8 = arith.constant 0 : index
      %c0_9 = arith.constant 0 : index
      %14 = vector.load %arg2[%c0_8, %c0_9] : memref<2x128xf32, #tpu.memory_space<vmem>>, vector<2x128xf32>
      tpu.vector_store %arg2[%c0_8, %c0_9], %13 {strides = array<i32>} : memref<2x128xf32, #tpu.memory_space<vmem>>, vector<2x128xf32>,
    } else {
    }
    %c0 = arith.constant 0 : index
    %c0_1 = arith.constant 0 : index
    %3 = vector.load %arg1[%c0, %c0_1] : memref<8x128xf32, #tpu.memory_space<vmem>>, vector<8x128xf32>
    %cst = arith.constant dense<0.000000e+00> : vector<128xf32>
    %4 = vector.multi_reduction <add>, %3, %cst [0] : vector<8x128xf32> to vector<128xf32>
    %5 = vector.shape_cast %4 : vector<128xf32> to vector<1x128xf32>
    %6 = arith.mulf %3, %3 : vector<8x128xf32>
    %cst_2 = arith.constant dense<0.000000e+00> : vector<128xf32>
    %7 = vector.multi_reduction <add>, %6, %cst_2 [0] : vector<8x128xf32> to vector<128xf32>
    %8 = vector.shape_cast %7 : vector<128xf32> to vector<1x128xf32>
    %c0_3 = arith.constant 0 : index
    %c0_4 = arith.constant 0 : index
    %9 = vector.load %arg2[%c0_3, %c0_4] : memref<2x128xf32, #tpu.memory_space<vmem>>, vector<2x128xf32>
    %10 = tpu.concatenate %5, %8 in 0 : vector<1x128xf32>, vector<1x128xf32> -> vector<2x128xf32>
    %11 = arith.addf %9, %10 : vector<2x128xf32>
    %c0_5 = arith.constant 0 : index
    %c0_6 = arith.constant 0 : index
    %12 = vector.load %arg2[%c0_5, %c0_6] : memref<2x128xf32, #tpu.memory_space<vmem>>, vector<2x128xf32>
    tpu.vector_store %arg2[%c0_5, %c0_6], %11 {strides = array<i32>} : memref<2x128xf32, #tpu.memory_space<vmem>>, vector<2x128xf32>,
    return
  }
  func.func @transform_0(%arg0: i32) -> (i32, i32) {
    %c0_i32 = arith.constant 0 : i32
    %c0_i32_0 = arith.constant 0 : i32
    return %arg0, %c0_i32 : i32, i32
  }
  func.func @transform_1(%arg0: i32) -> (i32, i32) {
    %c0_i32 = arith.constant 0 : i32
    %c0_i32_0 = arith.constant 0 : i32
    %c0_i32_1 = arith.constant 0 : i32
    return %c0_i32, %c0_i32_0 : i32, i32
  }
}

</mosaic_0001>

<bundles_post_ra>
// kernel: tpu_custom_call.1
= control target key start
LH: loop header
LB: loop body
LE: loop exit
PB: predicated region body
PF: predicated region fallthrough
CT: control target
= control target key end

     0   :  { %6 = vsyncpa [#allocation3], 0  ;;  %s473_s0 = inlined_call_operand.hbm [shape: f32[48,128], index: 0, kind: input, shape index: {}]   ;;  %s474_s1 = inlined_call_operand.hbm [shape: f32[2,128], index: 1, kind: output, shape index: {}]  }
   0x1   :  { %8 = vsyncpa [#allocation3 + $0x1], 0 }
   0x2   :  { %9 = vsyncpa [#allocation4], 0  ;;  %s365_s6 = smov 0   ;;  %s367_s7 = smov 0  }
   0x3   :  { %s369_s8 = smov 0   ;;  %s371_s9 = smov 0  }
   0x4 LB: > { %s384_s10 = sadd.s32 4294967295, %s350_s9   ;;  %s387_s11 = sadd.s32 1, %s350_s9   ;;  %s350_s9 = sphi %s371_s9, %s484_s9   ;;  %s346_s8 = sphi %s369_s8, %s483_s8   ;;  %s342_s7 = sphi %s367_s7, %s482_s7   ;;  %s338_s6 = sphi %s365_s6, %s481_s6  }
   0x5   : > { %s19_s12 = ssub.s32 %s350_s9, %s387_s11  ;;  %s22_s13 = sadd.s32 1, %s346_s8 }
   0x6   : > { %p20_p0 = scmp.eq.s32.totalorder %s19_s12, 0  ;;  %p29_p1 = scmp.ne.s32.totalorder %s346_s8, %s342_s7 }
   0x7   : > { %p30_p2 = scmp.eq.s32.totalorder %s350_s9, 0  ;;  %p35_p3 = scmp.ne.s32.totalorder %s342_s7, %s338_s6 }
   0x8   : > { %s397_s14 = scalar_select %p20_p0, %s346_s8, %s22_s13  }
   0x9   : > { %p31_p4 = por %p30_p2, %p29_p1  ;;  %p36_p5 = scmp.eq.s32.totalorder %s384_s10, 0 }
   0xa   : > { %p223_p6 = scmp.lt.s32.totalorder %s350_s9, 6  ;;  %s80_s16 = sand.u32 1, %s346_s8  }
   0xb   : > { %p401_p7 = por %p36_p5, %p35_p3  ;;  %s204_s17 = sshll.u32 %s80_s16, 3 }
   0xc   : > { %s205_s18 = sshll.u32 %s350_s9, 7  ;;  %s84_s22 = scalar_lea.vmem [#allocation2], %s204_s17 }
   0xd   : > { %s476_s15 = scalar_select %p401_p7, 1, 0 }
   0xe   : > { %s410_s21 = scalar_lea.hbm %s473_s0, %s205_s18  ;;  %s91_s23 = sshll.u32 %s84_s22, 4  ;;  %s412_s23 = int_to_ptr.vmem [resolvable:$true] %s91_s23 }
   0xf   : > { %p414_p8 = pnand %p223_p6, %p31_p4  ;;  %s81_s25 = scalar_lea.sflag [#allocation3], %s80_s16 }
  0x10   : > { %s260_s26 = scalar_lea.hbm %s410_s21, 128  ;;  %s265_s29 = scalar_lea.hbm %s473_s0, 768 }
  0x11   : > { %p261_p11 = scmp.ne.s32.totalorder %s410_s21, %s260_s26  ;;  %p262_p12 = pneg %p414_p8 }
  0x12   : > { %p266_p1 = scmp.lt.s32.totalorder %s410_s21, %s473_s0  ;;  %p267_p2 = scmp.lt.s32.totalorder %s265_s29, %s260_s26 }
  0x13   : > { %p263_p13 = pnand %p262_p12, %p261_p11 }
  0x14   : > { %p268_p3 = por %p267_p2, %p266_p1 }
  0x15   : > { %p264_p0 = pneg %p263_p13 }
  0x17   : > { %p269_p4 = pnand %p268_p3, %p264_p0 }
  0x19   : > { %272 = shalt.err (!%p269_p4)
}
  0x1a   : > { %s273_s3 = scalar_lea.vmem %s412_s23, 128  ;;  %s352_s4 = smov [#allocation2]  }
  0x1b   : > { %p274_p5 = scmp.ne.s32.totalorder %s412_s23, %s273_s3  ;;  %s278_s5 = sshll.u32 %s352_s4, 4  ;;  %s279_s5 = int_to_ptr.vmem [resolvable:$false] %s278_s5 }
  0x1c   : > { %s280_s6 = scalar_lea.vmem %s279_s5, 256  ;;  %p281_p13 = scmp.lt.s32.totalorder %s412_s23, %s279_s5 }
  0x1d   : > { %p276_p6 = pnand %p274_p5, %p262_p12  ;;  %p282_p9 = scmp.lt.s32.totalorder %s280_s6, %s273_s3 }
  0x1f   : > { %p277_p11 = pneg %p276_p6  ;;  %p283_p10 = por %p282_p9, %p281_p13 }
  0x21   : > { %p284_p7 = pnand %p283_p10, %p277_p11 }
  0x23   : > { %287 = shalt.err (!%p284_p7)
}
  0x24   : > { %222 = dma.hbm_to_vmem [thread:$0]  (!%p414_p8), %s410_s21, 128, %s412_s23, %s81_s25  }
  0x25   : > { %p478_p0 = scmp.lt.s32.totalorder %s350_s9, 7  ;;  %p479_p1 = scmp.ge.s32.totalorder %s350_s9, 1 }
  0x27   : > { %p97_p12 = pnand %p479_p1, %p478_p0 }
  0x28   : > { %s102_s12 = sand.u32 (!%p97_p12), 1, %s342_s7   ;;  %p480_p9 = scmp.ne.s32.totalorder (!%p97_p12), %s476_s15, 0 }
  0x29   : > { %100 = sbr.rel (%p97_p12) target bundleno = 79 (0x4f), region = 24  ;;  %s207_s13 = sshll.u32 (!%p97_p12), %s102_s12, 3 }
  0x2a   : > { %s103_s16 = scalar_lea.sflag (!%p97_p12), [#allocation3], %s102_s12  ;;  %s106_s17 = scalar_lea.vmem (!%p97_p12), [#allocation2], %s207_s13 }
  0x2e   : > { %329 = dma.done.wait (%p480_p9), %s103_s16, 128  }
  0x2f   : > { %331 = vsyncadd (%p480_p9), %s103_s16, 4294967168  ;;  %p208_p7 = scmp.ne.s32.totalorder %s384_s10, 0 }
  0x31   : > { %123 = sbr.rel (%p208_p7) target bundleno = 56 (0x38), region = 32 }
  0x36   : > { %v353_v0 = vmov 0.0  }
  0x37   : > { %124 = vst [vmem:[#allocation5] sm:$0x3] %v353_v0 }
  0x38 PF: > { %v125_v1 = vld [vmem:[%s106_s17] sm:$0xff]  ;;  %vm140_vm0 = vcmask 1040384   ;;  %s354_s9 = smov [#allocation5]   ;;  %p224_p8 = scmp.eq.s32.totalorder %s384_s10, 5 }
  0x39   : > { %v126_v2 = vrot.slane %v125_v1, 4  ;;  %v132_v3 = vmul.f32 %v125_v1, %v125_v1  ;;  %s151_s15 = sshll.u32 %s354_s9, 4  ;;  %s152_s15 = int_to_ptr.vmem [resolvable:$true] %s151_s15 }
  0x3a   : > { %s288_s18 = scalar_lea.vmem %s152_s15, 32  ;;  %p295_p4 = scmp.lt.s32.totalorder %s152_s15, %s152_s15 }
  0x3b   : > { %v127_v4 = vadd.f32 %v126_v2, %v125_v1  ;;  %v133_v5 = vrot.slane %v132_v3, 4  ;;  %p289_p10 = scmp.ne.s32.totalorder %s152_s15, %s288_s18  ;;  %p296_p5 = scmp.lt.s32.totalorder %s288_s18, %s288_s18 }
  0x3d   : > { %v128_v6 = vrot.slane %v127_v4, 2  ;;  %v134_v7 = vadd.f32 %v133_v5, %v132_v3  ;;  %p290_p2 = pnand %p289_p10, %p224_p8  ;;  %p297_p6 = por %p296_p5, %p295_p4 }
  0x3e   : > { %v139_v15 = vld [vmem:[#allocation5] sm:$0x3] }
  0x3f   : > { %v129_v8 = vadd.f32 %v128_v6, %v127_v4  ;;  %v135_v9 = vrot.slane %v134_v7, 2  ;;  %p291_p3 = pneg %p290_p2 }
  0x41   : > { %v130_v10 = vrot.slane %v129_v8, 1  ;;  %v136_v11 = vadd.f32 %v135_v9, %v134_v7  ;;  %p298_p11 = pnand %p297_p6, %p291_p3 }
  0x43   : > { %v131_v12 = vadd.f32 %v130_v10, %v129_v8  ;;  %v137_v13 = vrot.slane %v136_v11, 1 }
  0x45   : > { %v138_v14 = vadd.f32 %v137_v13, %v136_v11 }
  0x47   : > { %v141_v16 = vsel %vm140_vm0, %v131_v12, %v138_v14 }
  0x48   : > { %v142_v17 = vadd.f32 %v141_v16, %v139_v15 }
  0x4a   : > { %143 = vst [vmem:[#allocation5] sm:$0x3] %v142_v17 }
  0x4b   : > { %301 = shalt.err (!%p298_p11)
}
  0x4c   : > { %216 = dma.vmem_to_hbm [thread:$0]  (%p224_p8), %s152_s15, 32, %s474_s1, [#allocation4]  }
  0x4d   : > { %333 = dma.done.wait (%p224_p8), [#allocation4], 32  }
  0x4e   : > { %335 = vsyncadd (%p224_p8), [#allocation4], 4294967264 }
  0x4f PF: > { %p12_p13 = scmp.ge.s32.totalorder %s387_s11, 8   ;;  %s481_s6 = smov %s342_s7 }
  0x50   : > { %s482_s7 = smov %s346_s8  ;;  %s483_s8 = smov %s397_s14 }
  0x51   : > { %s484_s9 = smov %s387_s11  ;;  %14 = sbr.rel (!%p12_p13) target bundleno = 4 (0x4), region = 65 }
  0x56   :  { %164 = vsyncpa [#allocation3], 1 }
  0x57   :  { %166 = vsyncpa [#allocation3 + $0x1], 1 }
  0x58   :  { %167 = vsyncpa [#allocation4], 1 }
  0x59   :  { %169 = vsyncpa [#allocation4 + $0x1], 1 }

</bundles_post_ra>
